<compile_context>
chip_gen: v7x
topology: tpu7x:2x2x1
jax: 0.10.0
libtpu: 0.0.40
codegen_flags: <defaults>
</compile_context>

<pallas_src>
import jax
import jax.numpy as jnp
from jax.experimental import pallas as pl
from jax.experimental.pallas import tpu as pltpu


def _pad8(n):
    return ((n + 7) // 8) * 8


def pixel_map_kernel(x_ref, w1_ref, shift_ref, w2_ref, o_ref):
    # x_ref:     (BN, C, TM)   channels on sublanes, pixels on lanes
    # w1_ref:    (C, C)        first 1x1 conv weights, BN scale folded (Cout, Cin)
    # shift_ref: (C, 1)        folded BatchNorm shift (beta - mean*scale)
    # w2_ref:    (NC, C)       second 1x1 conv weights (Cout, Cin)
    # o_ref:     (BN, NC, TM)
    w1 = w1_ref[...]
    w2 = w2_ref[...]
    shift = shift_ref[...]
    for b in range(x_ref.shape[0]):            # BN is a small static constant (<= 8)
        x = x_ref[b].astype(jnp.float32)                                  # (C, TM)
        h = jnp.dot(w1, x, preferred_element_type=jnp.float32) + shift    # (C, TM)
        h = jnp.maximum(h, 0.0)                                           # ReLU
        y = jnp.dot(w2, h, preferred_element_type=jnp.float32)            # (NC, TM)
        o_ref[b] = y.astype(o_ref.dtype)


def _choose_tiling(N, M, C, NC, dtype_bytes,
                   target_step_bytes=3 << 20,      # ~3 MB HBM traffic per grid step
                   vmem_buffer_budget=16 << 20,    # double-buffered in+out cap
                   min_steps=4, max_batch_block=8):
    """Pick (batch_block, pixel_tile) so each grid step is big enough to hide
    the per-step pipeline overhead while keeping >= min_steps steps."""
    hbm_per_px = (C + NC) * dtype_bytes
    vmem_per_px = (_pad8(C) + _pad8(NC)) * 4 * 2        # f32 VMEM, double buffered
    p_target = max(128, target_step_bytes // hbm_per_px)
    p_vmem = max(128, vmem_buffer_budget // vmem_per_px)
    p = min(p_target, p_vmem)                           # pixels per grid step

    if M > p:
        # Large image: tile the pixel axis (lane-dense multiples of 128).
        bn = 1
        tile_m = max(128, (p // 128) * 128)
    else:
        # Small image: whole image per step, pack several images per step.
        tile_m = M
        bn = max(1, min(N, max_batch_block, p // max(M, 1)))
        while N % bn:                                   # exact batch blocking
            bn -= 1

    def n_steps(bn_, tm_):
        return pl.cdiv(N, bn_) * pl.cdiv(M, tm_)

    # Guarantee enough grid steps for DMA/compute overlap + megacore sharding.
    while n_steps(bn, tile_m) < min_steps and bn > 1:
        bn = max(1, bn // 2)
    while n_steps(bn, tile_m) < min_steps and tile_m > 128 and M > 128:
        tile_m = max(128, ((tile_m // 2) // 128) * 128)
    while N % bn:                                       # keep bn an exact divisor
        bn -= 1

    return bn, tile_m


def pixel_map_estimator(x_nchw, w1, bn_gamma, bn_beta, bn_mean, bn_var, w2,
                        eps=1e-5):
    N, C, H, W = x_nchw.shape
    num_class = w2.shape[0]
    M = H * W

    # Fold BatchNorm (inference semantics): scale goes into W1, shift stays.
    scale = bn_gamma / jnp.sqrt(bn_var + eps)                 # (C,)
    shift = (bn_beta - bn_mean * scale).astype(jnp.float32)   # (C,)

    # Conv2d weight (Cout, Cin, 1, 1) -> (Cout, Cin); scale rows by BN scale.
    w1_s = (w1.reshape(C, C) * scale[:, None]).astype(jnp.float32)
    w2_m = w2.reshape(num_class, C).astype(jnp.float32)

    # NCHW -> (N, C, M): pure reshape, zero extra HBM traffic.
    x = x_nchw.reshape(N, C, M)
    dtype_bytes = x.dtype.itemsize

    bn_blk, tile_m = _choose_tiling(N, M, C, num_class, dtype_bytes)
    grid = (pl.cdiv(N, bn_blk), pl.cdiv(M, tile_m))

    # Scoped-VMEM: double-buffered, sublane-padded in+out tiles plus headroom
    # for the (tiny) weight tiles.  Stays within v7x's 64 MiB physical VMEM,
    # and lifts v5e's 16 MiB scoped default when big tiles need it.
    buf_bytes = 2 * bn_blk * (_pad8(C) + _pad8(num_class)) * tile_m * 4
    vmem_limit = int(min(max(buf_bytes + (8 << 20), 16 << 20), 48 << 20))

    cost = pl.CostEstimate(
        flops=2 * N * M * (C * C + C * num_class),
        transcendentals=0,
        bytes_accessed=N * M * (C + num_class) * dtype_bytes
                       + (C * C + C + num_class * C) * 4,
    )

    out = pl.pallas_call(
        pixel_map_kernel,
        out_shape=jax.ShapeDtypeStruct((N, num_class, M), x.dtype),
        grid_spec=pltpu.PrefetchScalarGridSpec(
            num_scalar_prefetch=0,
            grid=grid,
            in_specs=[
                pl.BlockSpec((bn_blk, C, tile_m), lambda n, m: (n, 0, m)),
                pl.BlockSpec((C, C), lambda n, m: (0, 0)),
                pl.BlockSpec((C, 1), lambda n, m: (0, 0)),
                pl.BlockSpec((num_class, C), lambda n, m: (0, 0)),
            ],
            out_specs=pl.BlockSpec((bn_blk, num_class, tile_m),
                                   lambda n, m: (n, 0, m)),
        ),
        compiler_params=pltpu.CompilerParams(
            dimension_semantics=("parallel", "parallel"),
            vmem_limit_bytes=vmem_limit),
        cost_estimate=cost,
    )(x, w1_s, shift.reshape(C, 1), w2_m)

    # (N, NC, M) -> (N, NC, H, W): free reshape, no transpose.
    return out.reshape(N, num_class, H, W)


def reference_forward(x_nchw, w1, bn_gamma, bn_beta, bn_mean, bn_var, w2,
                      eps=1e-5):
    # Pure-JAX reference of the PyTorch forward (BN in eval mode).
    N, C, H, W = x_nchw.shape
    num_class = w2.shape[0]
    x = jnp.transpose(x_nchw, (0, 2, 3, 1)).reshape(-1, C)
    h = x @ w1.reshape(C, C).T
    h = (h - bn_mean) / jnp.sqrt(bn_var + eps) * bn_gamma + bn_beta
    h = jnp.maximum(h, 0.0)
    y = h @ w2.reshape(num_class, C).T
    return jnp.transpose(y.reshape(N, H, W, num_class), (0, 3, 1, 2))


if __name__ == "__main__":
    in_chn, num_class = 4, 2
    N, H, W = 2, 16, 16

    key = jax.random.PRNGKey(0)
    k_x, k_w1, k_w2, k_g, k_b, k_m, k_v = jax.random.split(key, 7)

    x = jax.random.normal(k_x, (N, in_chn, H, W), dtype=jnp.float32)
    # Conv weights: (Cout, Cin, 1, 1)
    w1 = jax.random.normal(k_w1, (in_chn, in_chn, 1, 1), jnp.float32) * 0.1
    w2 = jax.random.normal(k_w2, (num_class, in_chn, 1, 1), jnp.float32) * 0.1
    # BatchNorm parameters / running stats (inference mode).
    bn_gamma = 1.0 + 0.05 * jax.random.normal(k_g, (in_chn,), jnp.float32)
    bn_beta = 0.05 * jax.random.normal(k_b, (in_chn,), jnp.float32)
    bn_mean = 0.1 * jax.random.normal(k_m, (in_chn,), jnp.float32)
    bn_var = 0.5 + jnp.abs(jax.random.normal(k_v, (in_chn,), jnp.float32))
    # TODO(synk): PyTorch BatchNorm2d in training mode would use batch stats;
    # here we implement the standard inference-mode semantics.

    out = pixel_map_estimator(x, w1, bn_gamma, bn_beta, bn_mean, bn_var, w2)
    out = jax.block_until_ready(out)

    ref = reference_forward(x, w1, bn_gamma, bn_beta, bn_mean, bn_var, w2)
    assert out.shape == (N, num_class, H, W), out.shape
    assert jnp.allclose(out, ref, atol=1e-5, rtol=1e-5), \
        float(jnp.max(jnp.abs(out - ref)))

    print("KERNEL_OK")
</pallas_src>

<mosaic_0001>
module attributes {stable_mosaic.version = 11 : i64} {
  func.func @pixel_map_kernel(%arg0: i32, %arg1: i32, %arg2: memref<1x4x128xf32, #tpu.memory_space<vmem>>, %arg3: memref<4x4xf32, #tpu.memory_space<vmem>>, %arg4: memref<4x1xf32, #tpu.memory_space<vmem>>, %arg5: memref<2x4xf32, #tpu.memory_space<vmem>>, %arg6: memref<1x2x128xf32, #tpu.memory_space<vmem>>) attributes {dimension_semantics = [#tpu.dimension_semantics<parallel>, #tpu.dimension_semantics<parallel>], iteration_bounds = array<i64: 2, 2>, scalar_prefetch = 0 : i64, scratch_operands = 0 : i64, tpu.core_type = #tpu.core_type<tc>, window_params = [{transform_indices = @transform_0, window_bounds = array<i64: 1, 4, 128>}, {pipeline_mode = #tpu.pipeline_mode<synchronous>, transform_indices = @transform_1, window_bounds = array<i64: 4, 4>}, {pipeline_mode = #tpu.pipeline_mode<synchronous>, transform_indices = @transform_2, window_bounds = array<i64: 4, 1>}, {pipeline_mode = #tpu.pipeline_mode<synchronous>, transform_indices = @transform_3, window_bounds = array<i64: 2, 4>}, {transform_indices = @transform_4, window_bounds = array<i64: 1, 2, 128>}]} {
    %c0 = arith.constant 0 : index
    %c0_0 = arith.constant 0 : index
    %0 = vector.load %arg3[%c0, %c0_0] : memref<4x4xf32, #tpu.memory_space<vmem>>, vector<4x4xf32>
    %c0_1 = arith.constant 0 : index
    %c0_2 = arith.constant 0 : index
    %1 = vector.load %arg5[%c0_1, %c0_2] : memref<2x4xf32, #tpu.memory_space<vmem>>, vector<2x4xf32>
    %c0_3 = arith.constant 0 : index
    %c0_4 = arith.constant 0 : index
    %2 = vector.load %arg4[%c0_3, %c0_4] : memref<4x1xf32, #tpu.memory_space<vmem>>, vector<4x1xf32>
    %c0_5 = arith.constant 0 : index
    %c0_6 = arith.constant 0 : index
    %c0_7 = arith.constant 0 : index
    %3 = vector.load %arg2[%c0_5, %c0_6, %c0_7] : memref<1x4x128xf32, #tpu.memory_space<vmem>>, vector<1x4x128xf32>
    %4 = vector.shape_cast %3 : vector<1x4x128xf32> to vector<4x128xf32>
    %cst = arith.constant dense<0.000000e+00> : vector<4x128xf32>
    %5 = tpu.matmul %0, %4, %cst {dimension_numbers = #tpu.dot_dimension_numbers<[1], [0], [0], [1], [0, 0, 1, 1], [], []>} : vector<4x4xf32>, vector<4x128xf32>, vector<4x128xf32> -> vector<4x128xf32>
    %6 = vector.broadcast %2 : vector<4x1xf32> to vector<4x128xf32>
    %7 = arith.addf %5, %6 : vector<4x128xf32>
    %cst_8 = arith.constant 0.000000e+00 : f32
    %8 = vector.broadcast %cst_8 : f32 to vector<4x128xf32>
    %9 = arith.maximumf %7, %8 : vector<4x128xf32>
    %cst_9 = arith.constant dense<0.000000e+00> : vector<2x128xf32>
    %10 = tpu.matmul %1, %9, %cst_9 {dimension_numbers = #tpu.dot_dimension_numbers<[1], [0], [0], [1], [0, 0, 1, 1], [], []>} : vector<2x4xf32>, vector<4x128xf32>, vector<2x128xf32> -> vector<2x128xf32>
    %c0_10 = arith.constant 0 : index
    %c0_11 = arith.constant 0 : index
    %c0_12 = arith.constant 0 : index
    %11 = vector.load %arg6[%c0_10, %c0_11, %c0_12] : memref<1x2x128xf32, #tpu.memory_space<vmem>>, vector<1x2x128xf32>
    %12 = vector.shape_cast %11 : vector<1x2x128xf32> to vector<2x128xf32>
    %13 = vector.shape_cast %10 : vector<2x128xf32> to vector<1x2x128xf32>
    tpu.vector_store %arg6[%c0_10, %c0_11, %c0_12], %13 {strides = array<i32>} : memref<1x2x128xf32, #tpu.memory_space<vmem>>, vector<1x2x128xf32>,
    return
  }
  func.func @transform_0(%arg0: i32, %arg1: i32) -> (i32, i32, i32) {
    %c0_i32 = arith.constant 0 : i32
    %c0_i32_0 = arith.constant 0 : i32
    return %arg0, %c0_i32, %arg1 : i32, i32, i32
  }
  func.func @transform_1(%arg0: i32, %arg1: i32) -> (i32, i32) {
    %c0_i32 = arith.constant 0 : i32
    %c0_i32_0 = arith.constant 0 : i32
    %c0_i32_1 = arith.constant 0 : i32
    return %c0_i32, %c0_i32_0 : i32, i32
  }
  func.func @transform_2(%arg0: i32, %arg1: i32) -> (i32, i32) {
    %c0_i32 = arith.constant 0 : i32
    %c0_i32_0 = arith.constant 0 : i32
    %c0_i32_1 = arith.constant 0 : i32
    return %c0_i32, %c0_i32_0 : i32, i32
  }
  func.func @transform_3(%arg0: i32, %arg1: i32) -> (i32, i32) {
    %c0_i32 = arith.constant 0 : i32
    %c0_i32_0 = arith.constant 0 : i32
    %c0_i32_1 = arith.constant 0 : i32
    return %c0_i32, %c0_i32_0 : i32, i32
  }
  func.func @transform_4(%arg0: i32, %arg1: i32) -> (i32, i32, i32) {
    %c0_i32 = arith.constant 0 : i32
    %c0_i32_0 = arith.constant 0 : i32
    return %arg0, %c0_i32, %arg1 : i32, i32, i32
  }
}

</mosaic_0001>

<bundles_post_ra>
// kernel: tpu_custom_call.1
= control target key start
LH: loop header
LB: loop body
LE: loop exit
PB: predicated region body
PF: predicated region fallthrough
CT: control target
= control target key end

     0   :  { %9 = vsyncpa [#allocation3], 0  ;;  %s976_s0 = inlined_call_operand.hbm [shape: f32[2,4,256], index: 0, kind: input, shape index: {}]   ;;  %s977_s1 = inlined_call_operand.vmem [shape: f32[4,4], index: 1, kind: input, shape index: {}]   ;;  %s978_s2 = inlined_call_operand.vmem [shape: f32[4,1], index: 2, kind: input, shape index: {}]   ;;  %s979_s3 = inlined_call_operand.vmem [shape: f32[2,4], index: 3, kind: input, shape index: {}]   ;;  %s980_s4 = inlined_call_operand.hbm [shape: f32[2,2,256], index: 4, kind: output, shape index: {}]  }
   0x1   :  { %11 = vsyncpa [#allocation3 + $0x1], 0 }
   0x2   :  { %12 = vsyncpa [#allocation4], 0 }
   0x3   :  { %14 = vsyncpa [#allocation4 + $0x1], 0  ;;  %s772_s15 = smov 0   ;;  %s774_s16 = smov 0  }
   0x4   :  { %s776_s17 = smov 0   ;;  %s778_s18 = smov 0  }
   0x5   :  { %s780_s19 = smov 0   ;;  %s782_s20 = smov 0  }
   0x6   :  { %s784_s21 = smov 0   ;;  %s786_s22 = smov 0  }
   0x7 LB: > { %s497_s23 = sadd.s32 4294967295, %s740_s22   ;;  %s498_s24 = sadd.s32 4294967294, %s740_s22   ;;  %s740_s22 = sphi %s786_s22, %s20_s22   ;;  %s736_s21 = sphi %s784_s21, %s1000_s21   ;;  %s732_s20 = sphi %s782_s20, %s999_s20   ;;  %s728_s19 = sphi %s780_s19, %s998_s19   ;;  %s724_s18 = sphi %s778_s18, %s997_s18   ;;  %s720_s17 = sphi %s776_s17, %s996_s17   ;;  %s716_s16 = sphi %s774_s16, %s995_s16   ;;  %s712_s15 = sphi %s772_s15, %s994_s15  }
   0x8   : > { %s29_s25 = sadd.s32 1, %s732_s20  ;;  %s32_s26 = sadd.s32 1, %s736_s21 }
   0x9   : > { %p30_p0 = scmp.ge.s32.totalorder %s29_s25, 2  ;;  %s41_s27 = sadd.s32 1, %s720_s17 }
   0xa   : > { %p48_p1 = scmp.ne.s32.totalorder %s720_s17, %s716_s16  ;;  %p49_p2 = scmp.eq.s32.totalorder %s740_s22, 0 }
   0xb   : > { %s1002_s25 = smov (%p30_p0, %s29_s25), 0  ;;  %s1004_s26 = smov (!%p30_p0, %s32_s26), %s736_s21 }
   0xc   : > { %s37_s28 = ssub.s32 %s732_s20, %s1002_s25  ;;  %p825_p3 = por %p49_p2, %p48_p1 }
   0xd   : > { %p34_p4 = scmp.ge.s32.totalorder %s1004_s26, 2  ;;  %p54_p5 = scmp.ne.s32.totalorder %s716_s16, %s712_s15 }
   0xe   : > { %p55_p6 = scmp.eq.s32.totalorder %s497_s23, 0  ;;  %p143_p7 = scmp.eq.s32.totalorder %s497_s23, 3 }
   0xf   : > { %s1006_s26 = smov (%p34_p4, %s1004_s26), 0  ;;  %p149_p10 = scmp.eq.s32.totalorder %s498_s24, 3 }
  0x10   : > { %984 = sst [smem:[#allocation8_spill]] %s1006_s26  ;;  %p833_p8 = por %p55_p6, %p54_p5 }
  0x11   : > { %p837_p9 = por %p143_p7, %p48_p1  ;;  %s36_s6 = ssub.s32 %s736_s21, %s1006_s26 }
  0x12   : > { %s38_s7 = sor.u32 %s37_s28, %s36_s6  ;;  %p843_p12 = por %p149_p10, %p54_p5 }
  0x13   : > { %s986_s5 = scalar_select %p837_p9, 1, 0 }
  0x14   : > { %p39_p11 = scmp.eq.s32.totalorder %s38_s7, 0  ;;  %p542_p13 = scmp.lt.s32.totalorder %s740_s22, 4 }
  0x15   : > { %s987_s8 = scalar_select %p843_p12, 1, 0 }
  0x16   : > { %s178_s9 = sand.u32 1, %s720_s17   ;;  %s502_s12 = sshll.u32 %s736_s21, 1 }
  0x17   : > { %s850_s10 = scalar_select %p39_p11, %s720_s17, %s41_s27  }
  0x18   : > { %s501_s11 = sshll.u32 %s178_s9, 2  ;;  %s187_s13 = sadd.s32 %s732_s20, %s502_s12 }
  0x19   : > { %s182_s14 = scalar_lea.vmem [#allocation2], %s501_s11  ;;  %s503_s26 = sshll.u32 %s187_s13, 6 }
  0x1a   : > { %s191_s23 = sshll.u32 %s182_s14, 4  ;;  %s859_s6 = scalar_lea.hbm %s976_s0, %s503_s26  ;;  %s854_s23 = int_to_ptr.vmem [resolvable:$true] %s191_s23 }
  0x1b   : > { %p863_p0 = pnand %p542_p13, %p825_p3  ;;  %s179_s7 = scalar_lea.sflag [#allocation3], %s178_s9 }
  0x1c   : > { %s612_s11 = scalar_lea.hbm %s859_s6, 64  ;;  %s617_s12 = scalar_lea.hbm %s976_s0, 256 }
  0x1d   : > { %p613_p4 = scmp.ne.s32.totalorder %s859_s6, %s612_s11  ;;  %p614_p5 = pneg %p863_p0 }
  0x1e   : > { %p618_p3 = scmp.lt.u32.totalorder %s859_s6, %s976_s0  ;;  %p619_p10 = scmp.lt.u32.totalorder %s617_s12, %s612_s11 }
  0x1f   : > { %p615_p6 = pnand %p614_p5, %p613_p4  ;;  %p621_p13 = scmp.lt.u32.totalorder %s612_s11, %s859_s6 }
  0x20   : > { %p620_p11 = por %p619_p10, %p618_p3 }
  0x21   : > { %p616_p7 = pneg %p615_p6 }
  0x22   : > { %p622_p1 = por %p621_p13, %p620_p11 }
  0x24   : > { %p623_p2 = pnand %p622_p1, %p616_p7 }
  0x26   : > { %626 = shalt.err (!%p623_p2)
}
  0x27   : > { %s627_s9 = scalar_lea.vmem %s854_s23, 64  ;;  %s742_s24 = smov [#allocation2]  }
  0x28   : > { %p628_p4 = scmp.ne.s32.totalorder %s854_s23, %s627_s9  ;;  %s632_s28 = sshll.u32 %s742_s24, 4  ;;  %s633_s28 = int_to_ptr.vmem [resolvable:$false] %s632_s28 }
  0x29   : > { %s634_s26 = scalar_lea.vmem %s633_s28, 128  ;;  %p635_p9 = scmp.lt.s32.totalorder %s854_s23, %s633_s28 }
  0x2a   : > { %p630_p6 = pnand %p628_p4, %p614_p5  ;;  %p636_p3 = scmp.lt.s32.totalorder %s634_s26, %s627_s9 }
  0x2c   : > { %p631_p12 = pneg %p630_p6  ;;  %p637_p10 = por %p636_p3, %p635_p9 }
  0x2e   : > { %p638_p11 = pnand %p637_p10, %p631_p12 }
  0x30   : > { %641 = shalt.err (!%p638_p11)
}
  0x31   : > { %537 = dma.hbm_to_vmem [thread:$0]  (!%p863_p0), %s859_s6, 64, %s854_s23, %s179_s7  }
  0x32   : > { %p989_p1 = scmp.lt.s32.totalorder %s740_s22, 5  ;;  %p990_p2 = scmp.ge.s32.totalorder %s740_s22, 1 }
  0x34   : > { %p197_p5 = pnand %p990_p2, %p989_p1 }
  0x35   : > { %s899_s11 = sand.u32 (!%p197_p5), 1, %s716_s16  }
  0x36   : > { %200 = sbr.rel (%p197_p5) target bundleno = 509 (0x1fd), region = 36  ;;  %s505_s29 = sshll.u32 (!%p197_p5), %s899_s11, 2 }
  0x37   : > { %s203_s12 = scalar_lea.sflag (!%p197_p5), [#allocation3], %s899_s11  ;;  %s206_s13 = scalar_lea.vmem (!%p197_p5), [#allocation2], %s505_s29 }
  0x3d   : > { %703 = dma.done.wait (%p833_p8), %s203_s12, 64  }
  0x3e   : > { %705 = vsyncadd (%p833_p8), %s203_s12, 4294967232  ;;  %v743_v0 = vmov 0.0   ;;  %vm744_vm0 = vmmov 0   ;;  %v745_v1 = vmov 0   ;;  %vm244_vm1 = vcmask 1043456   ;;  %s506_s9 = sshll.u32 %s899_s11, 1 }
  0x3f   : > { %520 = vmatprep.subr.mxu0 %v743_v0  ;;  %522 = vmatprep.mubr.msk.f32.mxu0 %vm744_vm0, %v743_v0  ;;  %vm240_vm2 = vcmask 31744   ;;  %v234_v2 = vld [vmem:[%s206_s13] sm:$0xf]  ;;  %s512_s24 = sshll.u32 %s728_s19, 1  ;;  %s230_s26 = scalar_lea.vmem [#allocation5], %s506_s9 }
  0x40   : > { %611 = vset.pattern.permute.xlu0 %v745_v1  ;;  %525 = vmatprep.subr.mxu1 %v743_v0  ;;  %v231_v3 = vld [vmem:[%s977_s1] sm:$0xf]  ;;  %s408_s28 = sadd.s32 %s724_s18, %s512_s24  ;;  %s412_s29 = sshll.u32 %s230_s26, 4  ;;  %s919_s29 = int_to_ptr.vmem [resolvable:$true] %s412_s29 }
  0x41   : > { %527 = vmatprep.mubr.msk.f32.mxu1 %vm744_vm0, %v743_v0  ;;  %v233_v4 = vld [vmem:[%s978_s2] sm:$0xf]  ;;  %521 = vmatpush3.msk.msra.mxu0 %vm244_vm1, %v234_v2  ;;  %s513_s12 = sshll.u32 %s408_s28, 5  ;;  %s397_s30 = scalar_lea.sflag [#allocation4], %s899_s11 }
  0x42   : > { %237 = vperm.xlu0 %611, %v233_v4   ;;  %523 = vmatmul.mubr.msk.f32.vlgmr.msra.gmra.mrb[0].mxu0 %vm240_vm2, %v231_v3  ;;  %v232_v10 = vld [vmem:[%s979_s3] sm:$0x3]  ;;  %s924_s6 = scalar_lea.hbm %s980_s4, %s513_s12  ;;  %s642_s27 = scalar_lea.vmem %s919_s29, 32 }
  0x43   : > { %p643_p8 = scmp.ne.s32.totalorder %s919_s29, %s642_s27  ;;  %p991_p9 = scmp.ne.s32.totalorder %s986_s5, 0 }
  0x44   : > { %s746_s18 = smov [#allocation5]  }
  0x45   : > { %p644_p12 = pnand %p643_p8, %p991_p9  ;;  %s646_s19 = sshll.u32 %s746_s18, 4  ;;  %s647_s19 = int_to_ptr.vmem [resolvable:$false] %s646_s19 }
  0x46   : > { %s648_s7 = scalar_lea.vmem %s647_s19, 64  ;;  %p649_p7 = scmp.lt.s32.totalorder %s919_s29, %s647_s19 }
  0x47   : > { %p645_p0 = pneg %p644_p12  ;;  %p650_p13 = scmp.lt.s32.totalorder %s648_s7, %s642_s27 }
  0x49   : > { %p651_p4 = por %p650_p13, %p649_p7 }
  0x4b   : > { %p652_p6 = pnand %p651_p4, %p645_p0 }
  0xc1   : > { %v238_v5 = vpop.permute.xlu0 %237 }
 0x115   : > { %v314_v6 = vpop.f32.mrb[0].mxu0 }
 0x116   : > { %v315_v7 = vadd.f32 %v314_v6, %v238_v5  ;;  %v524_v8 = vpop.f32.mrb[1].mxu0 }
 0x118   : > { %v318_v9 = vmax.f32 %v315_v7, 0.0 }
 0x11a   : > { %526 = vmatpush3.msk.msra.mxu1 %vm244_vm1, %v318_v9 }
 0x11b   : > { %528 = vmatmul.mubr.msk.f32.vlgmr.msra.gmra.mrb[0].mxu1 %vm240_vm2, %v232_v10 }
 0x1ee   : > { %v391_v11 = vpop.f32.mrb[0].mxu1 }
 0x1ef   : > { %395 = vst [vmem:[%s230_s26] sm:$0x3] %v391_v11  ;;  %v529_v12 = vpop.f32.mrb[1].mxu1 }
 0x1f0   : > { %655 = shalt.err (!%p652_p6)
}
 0x1f1   : > { %s656_s11 = scalar_lea.hbm %s924_s6, 32  ;;  %s660_s24 = scalar_lea.hbm %s980_s4, 128 }
 0x1f2   : > { %p657_p3 = scmp.ne.s32.totalorder %s924_s6, %s656_s11  ;;  %p661_p1 = scmp.lt.u32.totalorder %s924_s6, %s980_s4 }
 0x1f3   : > { %p662_p2 = scmp.lt.u32.totalorder %s660_s24, %s656_s11  ;;  %p664_p8 = scmp.lt.u32.totalorder %s656_s11, %s924_s6 }
 0x1f4   : > { %p658_p10 = pnand %p657_p3, %p991_p9 }
 0x1f5   : > { %p663_p5 = por %p662_p2, %p661_p1 }
 0x1f6   : > { %p659_p11 = pneg %p658_p10 }
 0x1f7   : > { %p665_p12 = por %p664_p8, %p663_p5 }
 0x1f9   : > { %p666_p0 = pnand %p665_p12, %p659_p11 }
 0x1fb   : > { %669 = shalt.err (!%p666_p0)
}
 0x1fc   : > { %532 = dma.vmem_to_hbm [thread:$0]  (%p991_p9), %s919_s29, 32, %s924_s6, %s397_s30  }
 0x1fd PF: > { %p543_p7 = scmp.ge.s32.totalorder %s740_s22, 2  ;;  %s424_s12 = sand.u32 1, %s712_s15  }
 0x1fe   : > { %p992_p13 = scmp.ne.s32.totalorder %s987_s8, 0  ;;  %s425_s13 = scalar_lea.sflag [#allocation4], %s424_s12 }
 0x200   : > { %p539_p4 = pnand %p543_p7, %p992_p13 }
 0x202   : > { %707 = dma.done.wait (!%p539_p4), %s425_s13, 32  }
 0x203   : > { %709 = vsyncadd (!%p539_p4), %s425_s13, 4294967264  ;;  %s20_s22 = sadd.s32 1, %s740_s22   ;;  %s993_s5 = sld [smem:[#allocation8_spill]] }
 0x204   : > { %p17_p6 = scmp.ge.s32.totalorder %s20_s22, 6   ;;  %s994_s15 = smov %s716_s16 }
 0x205   : > { %s995_s16 = smov %s720_s17  ;;  %s996_s17 = smov %s850_s10 }
 0x206   : > { %s997_s18 = smov %s732_s20  ;;  %s998_s19 = smov %s736_s21 }
 0x207   : > { %s999_s20 = smov %s1002_s25  ;;  %19 = sbr.rel (!%p17_p6) target bundleno = 7 (0x7), region = 81 }
 0x209   : > { %s1000_s21 = smov %s993_s5 }
 0x20e   :  { %430 = vsyncpa [#allocation3], 1 }
 0x20f   :  { %432 = vsyncpa [#allocation3 + $0x1], 1 }
 0x210   :  { %433 = vsyncpa [#allocation4], 1 }
 0x211   :  { %435 = vsyncpa [#allocation4 + $0x1], 1 }

</bundles_post_ra>
